<compile_context>
chip_gen: v7x
topology: tpu7x:2x2x1
jax: 0.10.0
libtpu: 0.0.40
codegen_flags: <defaults>
</compile_context>

<pallas_src>
import functools

import jax
import jax.numpy as jnp
from jax.experimental import pallas as pl
from jax.experimental.pallas import tpu as pltpu

_LANE = 128
_SUBLANE = 8


def _round_up(x: int, m: int) -> int:
    return ((x + m - 1) // m) * m


def _lane_pad(x, target):
    """Zero-pad the last (lane) dim of an in-kernel value up to `target`."""
    cur = x.shape[-1]
    if cur == target:
        return x
    pad = jnp.zeros((x.shape[0], target - cur), x.dtype)
    return jnp.concatenate([x, pad], axis=-1)


def _make_kernel(n_shared: int, n_pi: int, n_vf: int,
                 out_pads: tuple, pi_pad: int, vf_pad: int):
    """Fused trunk + two heads. All layer widths are lane-padded (mult. of 128)."""

    def kernel(*refs):
        x_ref = refs[0]          # (TB, D) f32 batch tile
        bias_ref = refs[1]       # (L, BMAX) f32, one packed row per layer
        w_refs = refs[2:-1]      # one bf16 (in_pad, out_pad) weight per layer
        out_ref = refs[-1]       # (TB, pi_pad + vf_pad) f32 lane-dense slab

        def linear_relu(h, layer_idx):
            out_pad = out_pads[layer_idx]
            # bf16 operands, f32 accumulation on the MXU.
            y = jnp.dot(h.astype(jnp.bfloat16), w_refs[layer_idx][...],
                        preferred_element_type=jnp.float32)
            y = y + bias_ref[layer_idx:layer_idx + 1, 0:out_pad]
            return jnp.maximum(y, 0.0)          # activation_fn = nn.ReLU

        # Shared trunk (computed once, reused by both heads).
        h = x_ref[...]
        li = 0
        for _ in range(n_shared):
            h = linear_relu(h, li)
            li += 1

        # Policy head.
        p = h
        for _ in range(n_pi):
            p = linear_relu(p, li)
            li += 1

        # Value head.
        v = h
        for _ in range(n_vf):
            v = linear_relu(v, li)
            li += 1

        # Lane-dense output slab written with one full-width unmasked store.
        p = _lane_pad(p, pi_pad)   # no-op when a head exists (already padded)
        v = _lane_pad(v, vf_pad)
        out_ref[...] = jnp.concatenate([p, v], axis=-1).astype(out_ref.dtype)

    return kernel


def _pad_layer(w, b, in_pad: int, out_pad: int):
    """Zero-pad one Linear layer to (in_pad, out_pad); returns bf16 W, f32 bias row."""
    in_dim, out_dim = w.shape
    w_p = jnp.zeros((in_pad, out_pad), jnp.float32).at[:in_dim, :out_dim].set(w)
    b_row = jnp.zeros((out_pad,), jnp.float32).at[:out_dim].set(
        jnp.asarray(b, jnp.float32).reshape(-1))
    return w_p.astype(jnp.bfloat16), b_row


def _pack_network(states_dim, shared_params, pi_params, vf_params):
    """Pad every layer's output width to a multiple of 128 lanes and pack biases."""
    w_list, b_rows, out_pads = [], [], []

    def pack_branch(in_width, layers):
        cur = in_width
        for (w, b) in layers:
            out_pad = _round_up(w.shape[1], _LANE)
            wp, brow = _pad_layer(w, b, cur, out_pad)
            w_list.append(wp)
            b_rows.append(brow)
            out_pads.append(out_pad)
            cur = out_pad
        return cur

    trunk_out = pack_branch(states_dim, shared_params)
    pi_out = pack_branch(trunk_out, pi_params)
    vf_out = pack_branch(trunk_out, vf_params)

    pi_pad = _round_up(pi_out, _LANE)
    vf_pad = _round_up(vf_out, _LANE)

    def real_dim(head_params):
        if head_params:
            return head_params[-1][0].shape[1]
        if shared_params:
            return shared_params[-1][0].shape[1]
        return states_dim

    pi_dim = real_dim(pi_params)
    vf_dim = real_dim(vf_params)

    bmax = max(out_pads) if out_pads else _LANE
    b_pack = jnp.stack(
        [jnp.zeros((bmax,), jnp.float32).at[:r.shape[0]].set(r) for r in b_rows])

    return w_list, b_pack, tuple(out_pads), pi_pad, vf_pad, pi_dim, vf_dim


def dualing_post_actor_critic_forward(states, shared_params, pi_params, vf_params,
                                      *, batch_tile: int = 256):
    """Fused forward. Each *_params is a list of (W [in,out] f32, b [1,out] f32)."""
    B, D = states.shape
    n_s, n_p, n_v = len(shared_params), len(pi_params), len(vf_params)
    if n_s + n_p + n_v == 0:
        return states, states   # degenerate: no layers at all

    (w_list, b_pack, out_pads, pi_pad, vf_pad,
     pi_dim, vf_dim) = _pack_network(D, shared_params, pi_params, vf_params)

    out_w = pi_pad + vf_pad
    # Batch tile: full batch if small, otherwise <=256 rows, sublane-aligned.
    # Ragged last tile (B % tb != 0) is handled by Pallas; each row of the MLP
    # is independent, so padded rows never contaminate valid outputs.
    if B <= batch_tile:
        tb = B
    else:
        tb = _round_up(min(batch_tile, B), _SUBLANE)
    grid = (pl.cdiv(B, tb),)

    kernel = _make_kernel(n_s, n_p, n_v, out_pads, pi_pad, vf_pad)

    in_specs = [
        pl.BlockSpec((tb, D), lambda i: (i, 0)),              # batch-tiled states
        pl.BlockSpec(b_pack.shape, lambda i: (0, 0)),         # packed biases (resident)
    ]
    for w in w_list:
        in_specs.append(pl.BlockSpec(w.shape, lambda i: (0, 0)))  # weights (resident)

    out = pl.pallas_call(
        kernel,
        out_shape=jax.ShapeDtypeStruct((B, out_w), jnp.float32),
        grid=grid,
        in_specs=in_specs,
        out_specs=pl.BlockSpec((tb, out_w), lambda i: (i, 0)),
        compiler_params=pltpu.CompilerParams(
            dimension_semantics=("parallel",),     # megacore: split batch across TCs
            vmem_limit_bytes=32 << 20,             # safe on v5e/v6e (128 MiB) and v7x (64 MiB)
        ),
    )(states, b_pack, *w_list)

    latent_pi = out[:, :pi_dim]
    latent_vf = out[:, pi_pad:pi_pad + vf_dim]
    return latent_pi, latent_vf


# ----------------------------------------------------------------------------
# Parameter construction mirroring DualingPost_ActorCritic.__init__
# ----------------------------------------------------------------------------

def _init_linear(key, in_dim, out_dim):
    """Deterministic init (uniform, like PyTorch's default bound 1/sqrt(in))."""
    kw, kb = jax.random.split(key)
    bound = 1.0 / jnp.sqrt(in_dim)
    w = jax.random.uniform(kw, (in_dim, out_dim), jnp.float32, -bound, bound)
    b = jax.random.uniform(kb, (1, out_dim), jnp.float32, -bound, bound)
    return w, b


def build_params(key, input_dim, net_arch):
    shared_dims, pi_dims, vf_dims = [], [], []
    for layer in net_arch:
        if isinstance(layer, int):
            shared_dims.append(layer)
        else:
            assert isinstance(layer, dict)
            if "pi" in layer:
                pi_dims = layer["pi"]
            if "vf" in layer:
                vf_dims = layer["vf"]
            break

    params = {"shared": [], "pi": [], "vf": []}
    last = input_dim
    for d in shared_dims:
        key, sub = jax.random.split(key)
        params["shared"].append(_init_linear(sub, last, d))
        last = d
    shared_out = last

    last = shared_out
    for d in pi_dims:
        key, sub = jax.random.split(key)
        params["pi"].append(_init_linear(sub, last, d))
        last = d

    last = shared_out
    for d in vf_dims:
        key, sub = jax.random.split(key)
        params["vf"].append(_init_linear(sub, last, d))
        last = d
    return params


def reference_forward(states, shared_params, pi_params, vf_params):
    """Pure-JAX reference with the same bf16-operand / f32-accumulate numerics."""
    def run(h, layers):
        for w, b in layers:
            y = jnp.dot(h.astype(jnp.bfloat16), w.astype(jnp.bfloat16),
                        preferred_element_type=jnp.float32)
            h = jnp.maximum(y + b, 0.0)
        return h

    shared_latent = run(states, shared_params)
    latent_vf = run(shared_latent, vf_params)
    latent_pi = run(shared_latent, pi_params)
    return latent_pi, latent_vf


if __name__ == "__main__":
    # Small shapes consistent with the module's forward (pure MLP on [B, input_dim]).
    input_dim = 32
    net_arch = [64, 64, {"pi": [32, 16], "vf": [32, 8]}]

    key = jax.random.PRNGKey(0)
    key_params, key_x1, key_x2 = jax.random.split(key, 3)

    params = build_params(key_params, input_dim, net_arch)

    fwd = jax.jit(functools.partial(
        dualing_post_actor_critic_forward,
        shared_params=params["shared"],
        pi_params=params["pi"],
        vf_params=params["vf"],
    ))

    # --- Case 1: tiny batch (single grid step, block == full array). ---------
    batch = 8
    states = jax.random.normal(key_x1, (batch, input_dim), jnp.float32)
    latent_pi, latent_vf = fwd(states)
    jax.block_until_ready((latent_pi, latent_vf))

    ref_pi, ref_vf = reference_forward(
        states, params["shared"], params["pi"], params["vf"])

    assert latent_pi.shape == (batch, 16) and latent_vf.shape == (batch, 8)
    # bf16 matmul operands -> loosened tolerance vs. pure-f32 math.
    assert jnp.allclose(latent_pi, ref_pi, atol=5e-3, rtol=5e-3)
    assert jnp.allclose(latent_vf, ref_vf, atol=5e-3, rtol=5e-3)

    # --- Case 2: multi-tile batch with a ragged last tile (grid > 1). --------
    batch2 = 300
    states2 = jax.random.normal(key_x2, (batch2, input_dim), jnp.float32)
    latent_pi2, latent_vf2 = fwd(states2)
    jax.block_until_ready((latent_pi2, latent_vf2))

    ref_pi2, ref_vf2 = reference_forward(
        states2, params["shared"], params["pi"], params["vf"])

    assert latent_pi2.shape == (batch2, 16) and latent_vf2.shape == (batch2, 8)
    assert jnp.allclose(latent_pi2, ref_pi2, atol=5e-3, rtol=5e-3)
    assert jnp.allclose(latent_vf2, ref_vf2, atol=5e-3, rtol=5e-3)

    print("KERNEL_OK")
</pallas_src>

<mosaic_0001>
module attributes {stable_mosaic.version = 11 : i64} {
  func.func @kernel(%arg0: i32, %arg1: memref<8x32xf32, #tpu.memory_space<vmem>>, %arg2: memref<6x128xf32, #tpu.memory_space<vmem>>, %arg3: memref<32x128xbf16, #tpu.memory_space<vmem>>, %arg4: memref<128x128xbf16, #tpu.memory_space<vmem>>, %arg5: memref<128x128xbf16, #tpu.memory_space<vmem>>, %arg6: memref<128x128xbf16, #tpu.memory_space<vmem>>, %arg7: memref<128x128xbf16, #tpu.memory_space<vmem>>, %arg8: memref<128x128xbf16, #tpu.memory_space<vmem>>, %arg9: memref<8x256xf32, #tpu.memory_space<vmem>>) attributes {dimension_semantics = [#tpu.dimension_semantics<parallel>], iteration_bounds = array<i64: 1>, scalar_prefetch = 0 : i64, scratch_operands = 0 : i64, tpu.core_type = #tpu.core_type<tc>, window_params = [{transform_indices = @transform_0, window_bounds = array<i64: 8, 32>}, {pipeline_mode = #tpu.pipeline_mode<synchronous>, transform_indices = @transform_1, window_bounds = array<i64: 6, 128>}, {pipeline_mode = #tpu.pipeline_mode<synchronous>, transform_indices = @transform_2, window_bounds = array<i64: 32, 128>}, {pipeline_mode = #tpu.pipeline_mode<synchronous>, transform_indices = @transform_3, window_bounds = array<i64: 128, 128>}, {pipeline_mode = #tpu.pipeline_mode<synchronous>, transform_indices = @transform_4, window_bounds = array<i64: 128, 128>}, {pipeline_mode = #tpu.pipeline_mode<synchronous>, transform_indices = @transform_5, window_bounds = array<i64: 128, 128>}, {pipeline_mode = #tpu.pipeline_mode<synchronous>, transform_indices = @transform_6, window_bounds = array<i64: 128, 128>}, {pipeline_mode = #tpu.pipeline_mode<synchronous>, transform_indices = @transform_7, window_bounds = array<i64: 128, 128>}, {transform_indices = @transform_8, window_bounds = array<i64: 8, 256>}]} {
    %c0 = arith.constant 0 : index
    %c0_0 = arith.constant 0 : index
    %0 = vector.load %arg1[%c0, %c0_0] : memref<8x32xf32, #tpu.memory_space<vmem>>, vector<8x32xf32>
    %1 = arith.truncf %0 : vector<8x32xf32> to vector<8x32xbf16>
    %c0_1 = arith.constant 0 : index
    %c0_2 = arith.constant 0 : index
    %2 = vector.load %arg3[%c0_1, %c0_2] : memref<32x128xbf16, #tpu.memory_space<vmem>>, vector<32x128xbf16>
    %cst = arith.constant dense<0.000000e+00> : vector<8x128xf32>
    %3 = tpu.matmul %1, %2, %cst {dimension_numbers = #tpu.dot_dimension_numbers<[1], [0], [0], [1], [0, 0, 1, 1], [], []>} : vector<8x32xbf16>, vector<32x128xbf16>, vector<8x128xf32> -> vector<8x128xf32>
    %c0_3 = arith.constant 0 : index
    %c0_4 = arith.constant 0 : index
    %4 = vector.load %arg2[%c0_3, %c0_4] : memref<6x128xf32, #tpu.memory_space<vmem>>, vector<1x128xf32>
    %5 = vector.broadcast %4 : vector<1x128xf32> to vector<8x128xf32>
    %6 = arith.addf %3, %5 : vector<8x128xf32>
    %cst_5 = arith.constant 0.000000e+00 : f32
    %7 = vector.broadcast %cst_5 : f32 to vector<8x128xf32>
    %8 = arith.maximumf %6, %7 : vector<8x128xf32>
    %9 = arith.truncf %8 : vector<8x128xf32> to vector<8x128xbf16>
    %c0_6 = arith.constant 0 : index
    %c0_7 = arith.constant 0 : index
    %10 = vector.load %arg4[%c0_6, %c0_7] : memref<128x128xbf16, #tpu.memory_space<vmem>>, vector<128x128xbf16>
    %cst_8 = arith.constant dense<0.000000e+00> : vector<8x128xf32>
    %11 = tpu.matmul %9, %10, %cst_8 {dimension_numbers = #tpu.dot_dimension_numbers<[1], [0], [0], [1], [0, 0, 1, 1], [], []>} : vector<8x128xbf16>, vector<128x128xbf16>, vector<8x128xf32> -> vector<8x128xf32>
    %c1 = arith.constant 1 : index
    %c0_9 = arith.constant 0 : index
    %12 = vector.load %arg2[%c1, %c0_9] : memref<6x128xf32, #tpu.memory_space<vmem>>, vector<1x128xf32>
    %13 = vector.broadcast %12 : vector<1x128xf32> to vector<8x128xf32>
    %14 = arith.addf %11, %13 : vector<8x128xf32>
    %cst_10 = arith.constant 0.000000e+00 : f32
    %15 = vector.broadcast %cst_10 : f32 to vector<8x128xf32>
    %16 = arith.maximumf %14, %15 : vector<8x128xf32>
    %17 = arith.truncf %16 : vector<8x128xf32> to vector<8x128xbf16>
    %c0_11 = arith.constant 0 : index
    %c0_12 = arith.constant 0 : index
    %18 = vector.load %arg5[%c0_11, %c0_12] : memref<128x128xbf16, #tpu.memory_space<vmem>>, vector<128x128xbf16>
    %cst_13 = arith.constant dense<0.000000e+00> : vector<8x128xf32>
    %19 = tpu.matmul %17, %18, %cst_13 {dimension_numbers = #tpu.dot_dimension_numbers<[1], [0], [0], [1], [0, 0, 1, 1], [], []>} : vector<8x128xbf16>, vector<128x128xbf16>, vector<8x128xf32> -> vector<8x128xf32>
    %c2 = arith.constant 2 : index
    %c0_14 = arith.constant 0 : index
    %20 = vector.load %arg2[%c2, %c0_14] : memref<6x128xf32, #tpu.memory_space<vmem>>, vector<1x128xf32>
    %21 = vector.broadcast %20 : vector<1x128xf32> to vector<8x128xf32>
    %22 = arith.addf %19, %21 : vector<8x128xf32>
    %cst_15 = arith.constant 0.000000e+00 : f32
    %23 = vector.broadcast %cst_15 : f32 to vector<8x128xf32>
    %24 = arith.maximumf %22, %23 : vector<8x128xf32>
    %25 = arith.truncf %24 : vector<8x128xf32> to vector<8x128xbf16>
    %c0_16 = arith.constant 0 : index
    %c0_17 = arith.constant 0 : index
    %26 = vector.load %arg6[%c0_16, %c0_17] : memref<128x128xbf16, #tpu.memory_space<vmem>>, vector<128x128xbf16>
    %cst_18 = arith.constant dense<0.000000e+00> : vector<8x128xf32>
    %27 = tpu.matmul %25, %26, %cst_18 {dimension_numbers = #tpu.dot_dimension_numbers<[1], [0], [0], [1], [0, 0, 1, 1], [], []>} : vector<8x128xbf16>, vector<128x128xbf16>, vector<8x128xf32> -> vector<8x128xf32>
    %c3 = arith.constant 3 : index
    %c0_19 = arith.constant 0 : index
    %28 = vector.load %arg2[%c3, %c0_19] : memref<6x128xf32, #tpu.memory_space<vmem>>, vector<1x128xf32>
    %29 = vector.broadcast %28 : vector<1x128xf32> to vector<8x128xf32>
    %30 = arith.addf %27, %29 : vector<8x128xf32>
    %cst_20 = arith.constant 0.000000e+00 : f32
    %31 = vector.broadcast %cst_20 : f32 to vector<8x128xf32>
    %32 = arith.maximumf %30, %31 : vector<8x128xf32>
    %33 = arith.truncf %16 : vector<8x128xf32> to vector<8x128xbf16>
    %c0_21 = arith.constant 0 : index
    %c0_22 = arith.constant 0 : index
    %34 = vector.load %arg7[%c0_21, %c0_22] : memref<128x128xbf16, #tpu.memory_space<vmem>>, vector<128x128xbf16>
    %cst_23 = arith.constant dense<0.000000e+00> : vector<8x128xf32>
    %35 = tpu.matmul %33, %34, %cst_23 {dimension_numbers = #tpu.dot_dimension_numbers<[1], [0], [0], [1], [0, 0, 1, 1], [], []>} : vector<8x128xbf16>, vector<128x128xbf16>, vector<8x128xf32> -> vector<8x128xf32>
    %c4 = arith.constant 4 : index
    %c0_24 = arith.constant 0 : index
    %36 = vector.load %arg2[%c4, %c0_24] : memref<6x128xf32, #tpu.memory_space<vmem>>, vector<1x128xf32>
    %37 = vector.broadcast %36 : vector<1x128xf32> to vector<8x128xf32>
    %38 = arith.addf %35, %37 : vector<8x128xf32>
    %cst_25 = arith.constant 0.000000e+00 : f32
    %39 = vector.broadcast %cst_25 : f32 to vector<8x128xf32>
    %40 = arith.maximumf %38, %39 : vector<8x128xf32>
    %41 = arith.truncf %40 : vector<8x128xf32> to vector<8x128xbf16>
    %c0_26 = arith.constant 0 : index
    %c0_27 = arith.constant 0 : index
    %42 = vector.load %arg8[%c0_26, %c0_27] : memref<128x128xbf16, #tpu.memory_space<vmem>>, vector<128x128xbf16>
    %cst_28 = arith.constant dense<0.000000e+00> : vector<8x128xf32>
    %43 = tpu.matmul %41, %42, %cst_28 {dimension_numbers = #tpu.dot_dimension_numbers<[1], [0], [0], [1], [0, 0, 1, 1], [], []>} : vector<8x128xbf16>, vector<128x128xbf16>, vector<8x128xf32> -> vector<8x128xf32>
    %c5 = arith.constant 5 : index
    %c0_29 = arith.constant 0 : index
    %44 = vector.load %arg2[%c5, %c0_29] : memref<6x128xf32, #tpu.memory_space<vmem>>, vector<1x128xf32>
    %45 = vector.broadcast %44 : vector<1x128xf32> to vector<8x128xf32>
    %46 = arith.addf %43, %45 : vector<8x128xf32>
    %cst_30 = arith.constant 0.000000e+00 : f32
    %47 = vector.broadcast %cst_30 : f32 to vector<8x128xf32>
    %48 = arith.maximumf %46, %47 : vector<8x128xf32>
    %49 = tpu.concatenate %32, %48 in 1 : vector<8x128xf32>, vector<8x128xf32> -> vector<8x256xf32>
    %c0_31 = arith.constant 0 : index
    %c0_32 = arith.constant 0 : index
    %50 = vector.load %arg9[%c0_31, %c0_32] : memref<8x256xf32, #tpu.memory_space<vmem>>, vector<8x256xf32>
    tpu.vector_store %arg9[%c0_31, %c0_32], %49 {strides = array<i32>} : memref<8x256xf32, #tpu.memory_space<vmem>>, vector<8x256xf32>,
    return
  }
  func.func @transform_0(%arg0: i32) -> (i32, i32) {
    %c0_i32 = arith.constant 0 : i32
    %c0_i32_0 = arith.constant 0 : i32
    return %arg0, %c0_i32 : i32, i32
  }
  func.func @transform_1(%arg0: i32) -> (i32, i32) {
    %c0_i32 = arith.constant 0 : i32
    %c0_i32_0 = arith.constant 0 : i32
    %c0_i32_1 = arith.constant 0 : i32
    return %c0_i32, %c0_i32_0 : i32, i32
  }
  func.func @transform_2(%arg0: i32) -> (i32, i32) {
    %c0_i32 = arith.constant 0 : i32
    %c0_i32_0 = arith.constant 0 : i32
    %c0_i32_1 = arith.constant 0 : i32
    return %c0_i32, %c0_i32_0 : i32, i32
  }
  func.func @transform_3(%arg0: i32) -> (i32, i32) {
    %c0_i32 = arith.constant 0 : i32
    %c0_i32_0 = arith.constant 0 : i32
    %c0_i32_1 = arith.constant 0 : i32
    return %c0_i32, %c0_i32_0 : i32, i32
  }
  func.func @transform_4(%arg0: i32) -> (i32, i32) {
    %c0_i32 = arith.constant 0 : i32
    %c0_i32_0 = arith.constant 0 : i32
    %c0_i32_1 = arith.constant 0 : i32
    return %c0_i32, %c0_i32_0 : i32, i32
  }
  func.func @transform_5(%arg0: i32) -> (i32, i32) {
    %c0_i32 = arith.constant 0 : i32
    %c0_i32_0 = arith.constant 0 : i32
    %c0_i32_1 = arith.constant 0 : i32
    return %c0_i32, %c0_i32_0 : i32, i32
  }
  func.func @transform_6(%arg0: i32) -> (i32, i32) {
    %c0_i32 = arith.constant 0 : i32
    %c0_i32_0 = arith.constant 0 : i32
    %c0_i32_1 = arith.constant 0 : i32
    return %c0_i32, %c0_i32_0 : i32, i32
  }
  func.func @transform_7(%arg0: i32) -> (i32, i32) {
    %c0_i32 = arith.constant 0 : i32
    %c0_i32_0 = arith.constant 0 : i32
    %c0_i32_1 = arith.constant 0 : i32
    return %c0_i32, %c0_i32_0 : i32, i32
  }
  func.func @transform_8(%arg0: i32) -> (i32, i32) {
    %c0_i32 = arith.constant 0 : i32
    %c0_i32_0 = arith.constant 0 : i32
    return %arg0, %c0_i32 : i32, i32
  }
}

</mosaic_0001>

<bundles_post_ra>
// kernel: dualing_post_actor_critic_forward.1
= control target key start
LH: loop header
LB: loop body
LE: loop exit
PB: predicated region body
PF: predicated region fallthrough
CT: control target
= control target key end

     0   :  { %13 = vsyncpa [#allocation3], 0  ;;  %s1303_s0 = inlined_call_operand.vmem [shape: f32[8,32], index: 0, kind: input, shape index: {}]   ;;  %s1304_s1 = inlined_call_operand.vmem [shape: f32[6,128], index: 1, kind: input, shape index: {}]   ;;  %s1305_s2 = inlined_call_operand.vmem [shape: bf16[32,128], index: 2, kind: input, shape index: {}]   ;;  %s1306_s3 = inlined_call_operand.hbm [shape: bf16[128,128], index: 3, kind: input, shape index: {}]   ;;  %s1307_s4 = inlined_call_operand.hbm [shape: bf16[128,128], index: 4, kind: input, shape index: {}]   ;;  %s1308_s5 = inlined_call_operand.hbm [shape: bf16[128,128], index: 5, kind: input, shape index: {}]   ;;  %s1309_s6 = inlined_call_operand.hbm [shape: bf16[128,128], index: 6, kind: input, shape index: {}]   ;;  %s1310_s7 = inlined_call_operand.vmem [shape: bf16[128,128], index: 7, kind: input, shape index: {}]   ;;  %s1311_s8 = inlined_call_operand.vmem [shape: f32[8,256], index: 8, kind: output, shape index: {}]  }
   0x1   :  { %14 = vsyncpa [#allocation5], 0 }
   0x2   :  { %15 = vsyncpa [#allocation8], 0  ;;  %s1065_s27 = smov [#allocation4]   ;;  %s1066_s29 = smov [#allocation2]  }
   0x3   :  { %s39_s28 = sshll.u32 %s1065_s27, 4  ;;  %s27_s30 = sshll.u32 %s1066_s29, 4  ;;  %s40_s28 = int_to_ptr.vmem [resolvable:$true] %s39_s28  ;;  %s1118_s30 = int_to_ptr.vmem [resolvable:$true] %s27_s30 }
   0x4   :  { %s971_s11 = scalar_lea.hbm %s1307_s4, 1024 }
   0x5   :  { %p972_p0 = scmp.ne.s32.totalorder %s1307_s4, %s971_s11  ;;  %p975_p1 = scmp.lt.u32.totalorder %s971_s11, %s1307_s4 }
   0x7   :  { %p977_p2 = pnand %p975_p1, %p972_p0 }
   0x9   :  { %980 = shalt.err (!%p977_p2)
}
   0xa   :  { %s981_s16 = scalar_lea.vmem %s40_s28, 1024  ;;  %p986_p4 = scmp.lt.s32.totalorder %s40_s28, %s40_s28 }
   0xb   :  { %p982_p3 = scmp.ne.s32.totalorder %s40_s28, %s981_s16  ;;  %p987_p5 = scmp.lt.s32.totalorder %s981_s16, %s981_s16 }
   0xd   :  { %p988_p6 = por %p987_p5, %p986_p4 }
   0xf   :  { %p989_p7 = pnand %p988_p6, %p982_p3 }
  0x11   :  { %992 = shalt.err (!%p989_p7)
}
  0x12   :  { %s1067_s17 = smov 64   ;;  %s1068_s18 = smov 4  }
  0x13   :  { %45 = dma.hbm_to_vmem [thread:$0]  %s1307_s4, 1024, %s40_s28, [#allocation5], %s1067_s17, %s1067_s17, %s1068_s18  }
  0x14   :  { %s993_s23 = scalar_lea.hbm %s1306_s3, 1024 }
  0x15   :  { %p994_p8 = scmp.ne.s32.totalorder %s1306_s3, %s993_s23  ;;  %p997_p9 = scmp.lt.u32.totalorder %s993_s23, %s1306_s3 }
  0x17   :  { %p999_p10 = pnand %p997_p9, %p994_p8 }
  0x19   :  { %1002 = shalt.err (!%p999_p10)
}
  0x1a   :  { %s1003_s29 = scalar_lea.vmem %s1118_s30, 1024  ;;  %p1008_p12 = scmp.lt.s32.totalorder %s1118_s30, %s1118_s30 }
  0x1b   :  { %p1004_p11 = scmp.ne.s32.totalorder %s1118_s30, %s1003_s29  ;;  %p1009_p13 = scmp.lt.s32.totalorder %s1003_s29, %s1003_s29 }
  0x1d   :  { %p1010_p0 = por %p1009_p13, %p1008_p12 }
  0x1f   :  { %p1011_p1 = pnand %p1010_p0, %p1004_p11 }
  0x21   :  { %1014 = shalt.err (!%p1011_p1)
}
  0x22   :  { %33 = dma.hbm_to_vmem [thread:$0]  %s1306_s3, 1024, %s1118_s30, [#allocation3], %s1067_s17, %s1067_s17, %s1068_s18  }
  0x23   :  { %s1069_s9 = smov [#allocation6]   ;;  %s1070_s11 = smov [#allocation7]  }
  0x24   :  { %s51_s10 = sshll.u32 %s1069_s9, 4  ;;  %s63_s12 = sshll.u32 %s1070_s11, 4  ;;  %s52_s10 = int_to_ptr.vmem [resolvable:$true] %s51_s10  ;;  %s1155_s12 = int_to_ptr.vmem [resolvable:$true] %s63_s12 }
  0x25   :  { %s1015_s15 = scalar_lea.hbm %s1308_s5, 1024 }
  0x26   :  { %p1016_p2 = scmp.ne.s32.totalorder %s1308_s5, %s1015_s15  ;;  %p1019_p3 = scmp.lt.u32.totalorder %s1015_s15, %s1308_s5 }
  0x28   :  { %p1021_p4 = pnand %p1019_p3, %p1016_p2 }
  0x2a   :  { %1024 = shalt.err (!%p1021_p4)
}
  0x2b   :  { %s1025_s3 = scalar_lea.vmem %s52_s10, 1024  ;;  %p1030_p6 = scmp.lt.s32.totalorder %s52_s10, %s52_s10 }
  0x2c   :  { %p1026_p5 = scmp.ne.s32.totalorder %s52_s10, %s1025_s3  ;;  %p1031_p7 = scmp.lt.s32.totalorder %s1025_s3, %s1025_s3 }
  0x2e   :  { %p1032_p8 = por %p1031_p7, %p1030_p6 }
  0x30   :  { %p1033_p9 = pnand %p1032_p8, %p1026_p5 }
  0x32   :  { %1036 = shalt.err (!%p1033_p9)
}
  0x33   :  { %57 = dma.hbm_to_vmem [thread:$0]  %s1308_s5, 1024, %s52_s10, [#allocation5], %s1067_s17, %s1067_s17, %s1068_s18  }
  0x34   :  { %s1037_s25 = scalar_lea.hbm %s1309_s6, 1024 }
  0x35   :  { %p1038_p10 = scmp.ne.s32.totalorder %s1309_s6, %s1037_s25  ;;  %p1041_p11 = scmp.lt.u32.totalorder %s1037_s25, %s1309_s6 }
  0x37   :  { %p1043_p12 = pnand %p1041_p11, %p1038_p10 }
  0x39   :  { %1046 = shalt.err (!%p1043_p12)
}
  0x3a   :  { %s1047_s28 = scalar_lea.vmem %s1155_s12, 1024  ;;  %p1052_p0 = scmp.lt.s32.totalorder %s1155_s12, %s1155_s12 }
  0x3b   :  { %p1048_p13 = scmp.ne.s32.totalorder %s1155_s12, %s1047_s28  ;;  %p1053_p1 = scmp.lt.s32.totalorder %s1047_s28, %s1047_s28 }
  0x3d   :  { %p1054_p2 = por %p1053_p1, %p1052_p0 }
  0x3f   :  { %p1055_p3 = pnand %p1054_p2, %p1048_p13 }
  0x41   :  { %1058 = shalt.err (!%p1055_p3)
}
  0x42   :  { %69 = dma.hbm_to_vmem [thread:$0]  %s1309_s6, 1024, %s1155_s12, [#allocation8], %s1067_s17, %s1067_s17, %s1068_s18  }
  0x43   :  { %1059 = dma.done.wait [#allocation3], 1024  }
  0x44   :  { %1060 = vsyncadd [#allocation3], 4294966272 }
  0x45   :  { %1061 = dma.done.wait [#allocation5], 2048  }
  0x46   :  { %1062 = vsyncadd [#allocation5], 4294965248 }
  0x47   :  { %1063 = dma.done.wait [#allocation8], 1024  }
  0x48   :  { %1064 = vsyncadd [#allocation8], 4294966272  ;;  %v1071_v0 = vmov 0.0   ;;  %vm1072_vm0 = vmmov 0   ;;  %v929_v1 = vld [vmem:[%s1305_s2] sm:$0xff]   ;;  %v930_v2 = vld [vmem:[%s1305_s2 + $0x8] sm:$0xff]  }
  0x49   :  { %813 = vmatprep.subr.bf16.mxu0 %v1071_v0  ;;  %817 = vmatprep.mubr.msk.bf16.mxu0 %vm1072_vm0, %v1071_v0  ;;  %v85_v3 = vld [vmem:[%s1303_s0] sm:$0xff]  ;;  %v932_v6 = vld [vmem:[#allocation2 + $0x8] sm:$0xff]   ;;  %vm108_vm1 = vcmask 261120   ;;  %v933_v7 = vld [vmem:[#allocation2 + $0x10] sm:$0xff]  }
  0x4a   :  { %821 = vmatprep.subr.bf16.mxu1 %v1071_v0  ;;  %837 = vmatprep.mubr.msk.bf16.mxu1 %vm1072_vm0, %v1071_v0  ;;  %v931_v4 = vld [vmem:[#allocation2] sm:$0xff]   ;;  %v86_v5 = vpack.c.bf16 %v85_v3, %v85_v3  ;;  %v934_v8 = vld [vmem:[#allocation2 + $0x18] sm:$0xff]   ;;  %v936_v10 = vld [vmem:[#allocation2 + $0x28] sm:$0xff]  }
  0x4b   :  { %814 = vmatpush3.bf16.msra.mxu0 %v929_v1  ;;  %822 = vmatpush3.bf16.msra.mxu1 %v931_v4  ;;  %v935_v9 = vld [vmem:[#allocation2 + $0x20] sm:$0xff]   ;;  %v937_v11 = vld [vmem:[#allocation2 + $0x30] sm:$0xff]   ;;  %v938_v12 = vld [vmem:[#allocation2 + $0x38] sm:$0xff]  }
  0x4c   :  { %815 = vmatprep.subr.bf16.mxu0 %v1071_v0  ;;  %823 = vmatprep.subr.bf16.mxu1 %v1071_v0  ;;  %v939_v13 = vld [vmem:[#allocation4] sm:$0xff]   ;;  %v940_v14 = vld [vmem:[#allocation4 + $0x8] sm:$0xff]   ;;  %v941_v15 = vld [vmem:[#allocation4 + $0x10] sm:$0xff]  }
  0x4d   :  { %v942_v16 = vld [vmem:[#allocation4 + $0x18] sm:$0xff]   ;;  %v943_v17 = vld [vmem:[#allocation4 + $0x20] sm:$0xff]   ;;  %v944_v18 = vld [vmem:[#allocation4 + $0x28] sm:$0xff]  }
  0x4e   :  { %v945_v19 = vld [vmem:[#allocation4 + $0x30] sm:$0xff]   ;;  %v716_v20 = vld [vmem:[%s1304_s1] ss:$0 sm:$0xff]  ;;  %v946_v28 = vld [vmem:[#allocation4 + $0x38] sm:$0xff]  }
  0x4f   :  { %816 = vmatpush3.bf16.msra.mxu0 %v930_v2  ;;  %824 = vmatpush3.bf16.msra.mxu1 %v932_v6  ;;  %v955_v29 = vld [vmem:[#allocation6] sm:$0xff]   ;;  %v956_v30 = vld [vmem:[#allocation6 + $0x8] sm:$0xff]   ;;  %v957_v31 = vld [vmem:[#allocation6 + $0x10] sm:$0xff]  }
  0x50   :  { %841 = vmatprep.subr.bf16.mxu0 %v1071_v0  ;;  %825 = vmatprep.subr.bf16.mxu1 %v1071_v0  ;;  %v958_v32 = vld [vmem:[#allocation6 + $0x18] sm:$0xff]   ;;  %v959_v33 = vld [vmem:[#allocation6 + $0x20] sm:$0xff]   ;;  %v960_v34 = vld [vmem:[#allocation6 + $0x28] sm:$0xff]  }
  0x51   :  { %v961_v35 = vld [vmem:[#allocation6 + $0x30] sm:$0xff]   ;;  %v720_v36 = vld [vmem:[%s1304_s1 + $0x1] ss:$0 sm:$0xff]  ;;  %v948_v45 = vld [vmem:[#allocation7 + $0x8] sm:$0xff]  }
  0x52   :  { %818 = vmatmul.mubr.msk.bf16.vlgmr.msra.gmra.mrb[0].mxu0 %vm108_vm1, %v86_v5  ;;  %v947_v43 = vld [vmem:[#allocation7] sm:$0xff]   ;;  %v949_v46 = vld [vmem:[#allocation7 + $0x10] sm:$0xff]   ;;  %v950_v47 = vld [vmem:[#allocation7 + $0x18] sm:$0xff]  }
  0x53   :  { %857 = vmatprep.mubr.msk.bf16.mxu0 %vm1072_vm0, %v1071_v0  ;;  %826 = vmatpush3.bf16.msra.mxu1 %v933_v7  ;;  %v951_v48 = vld [vmem:[#allocation7 + $0x20] sm:$0xff]   ;;  %v952_v49 = vld [vmem:[#allocation7 + $0x28] sm:$0xff]   ;;  %v953_v50 = vld [vmem:[#allocation7 + $0x30] sm:$0xff]  }
  0x54   :  { %827 = vmatprep.subr.bf16.mxu1 %v1071_v0  ;;  %842 = vmatpush3.bf16.msra.mxu0 %v939_v13  ;;  %v954_v51 = vld [vmem:[#allocation7 + $0x38] sm:$0xff]   ;;  %v729_v53 = vld [vmem:[%s1304_s1 + $0x2] ss:$0 sm:$0xff]  ;;  %v964_v62 = vld [vmem:[%s1310_s7 + $0x8] sm:$0xff]  }
  0x55   :  { %843 = vmatprep.subr.bf16.mxu0 %v1071_v0  ;;  %v962_v52 = vld [vmem:[#allocation6 + $0x38] sm:$0xff]   ;;  %v963_v60 = vld [vmem:[%s1310_s7] sm:$0xff]   ;;  %v965_v63 = vld [vmem:[%s1310_s7 + $0x10] sm:$0xff]  }
  0x56   :  { %v966_v1 = vld [vmem:[%s1310_s7 + $0x18] sm:$0xff]   ;;  %v967_v2 = vld [vmem:[%s1310_s7 + $0x20] sm:$0xff]   ;;  %v968_v3 = vld [vmem:[%s1310_s7 + $0x28] sm:$0xff]  }
  0x57   :  { %828 = vmatpush3.bf16.msra.mxu1 %v934_v8  ;;  %v969_v4 = vld [vmem:[%s1310_s7 + $0x30] sm:$0xff]   ;;  %v747_v5 = vld [vmem:[%s1304_s1 + $0x4] ss:$0 sm:$0xff]  ;;  %v970_v7 = vld [vmem:[%s1310_s7 + $0x38] sm:$0xff]  }
  0x58   :  { %829 = vmatprep.subr.bf16.mxu1 %v1071_v0  ;;  %844 = vmatpush3.bf16.msra.mxu0 %v940_v14  ;;  %v738_v14 = vld [vmem:[%s1304_s1 + $0x3] ss:$0 sm:$0xff] }
  0x59   :  { %845 = vmatprep.subr.bf16.mxu0 %v1071_v0 }
  0x5b   :  { %830 = vmatpush3.bf16.msra.mxu1 %v935_v9 }
  0x5c   :  { %831 = vmatprep.subr.bf16.mxu1 %v1071_v0  ;;  %846 = vmatpush3.bf16.msra.mxu0 %v941_v15 }
  0x5d   :  { %847 = vmatprep.subr.bf16.mxu0 %v1071_v0 }
  0x5f   :  { %832 = vmatpush3.bf16.msra.mxu1 %v936_v10 }
  0x60   :  { %833 = vmatprep.subr.bf16.mxu1 %v1071_v0  ;;  %848 = vmatpush3.bf16.msra.mxu0 %v942_v16 }
  0x61   :  { %849 = vmatprep.subr.bf16.mxu0 %v1071_v0 }
  0x63   :  { %834 = vmatpush3.bf16.msra.mxu1 %v937_v11 }
  0x64   :  { %835 = vmatprep.subr.bf16.mxu1 %v1071_v0  ;;  %850 = vmatpush3.bf16.msra.mxu0 %v943_v17 }
  0x65   :  { %851 = vmatprep.subr.bf16.mxu0 %v1071_v0 }
  0x67   :  { %836 = vmatpush3.bf16.msra.mxu1 %v938_v12 }
  0x68   :  { %861 = vmatprep.subr.bf16.mxu1 %v1071_v0  ;;  %852 = vmatpush3.bf16.msra.mxu0 %v944_v18 }
  0x69   :  { %853 = vmatprep.subr.bf16.mxu0 %v1071_v0 }
  0x6c   :  { %854 = vmatpush3.bf16.msra.mxu0 %v945_v19 }
  0x6d   :  { %855 = vmatprep.subr.bf16.mxu0 %v1071_v0 }
  0x70   :  { %856 = vmatpush3.bf16.msra.mxu0 %v946_v28 }
  0x71   :  { %881 = vmatprep.subr.bf16.mxu0 %v1071_v0 }
 0x125   :  { %v146_v21 = vpop.f32.mrb[0].mxu0 }
 0x126   :  { %v147_v22 = vadd.f32 %v716_v20, %v146_v21  ;;  %v819_v23 = vpop.f32.mrb[1].mxu0 }
 0x127   :  { %v149_v24 = vpop.f32.mrb[2].mxu0 }
 0x128   :  { %v152_v25 = vmax.f32 %v147_v22, 0.0  ;;  %v820_v26 = vpop.f32.mrb[3].mxu0 }
 0x12a   :  { %v153_v27 = vpack.c.bf16 %v152_v25, %v152_v25 }
 0x12c   :  { %838 = vmatmul.mubr.bf16.vlgmr.msra.gmra.mrb[0].mxu1 %v153_v27 }
 0x12d   :  { %877 = vmatprep.mubr.msk.bf16.mxu1 %vm1072_vm0, %v1071_v0  ;;  %862 = vmatpush3.bf16.msra.mxu1 %v955_v29 }
 0x12e   :  { %863 = vmatprep.subr.bf16.mxu1 %v1071_v0 }
 0x131   :  { %864 = vmatpush3.bf16.msra.mxu1 %v956_v30 }
 0x132   :  { %865 = vmatprep.subr.bf16.mxu1 %v1071_v0 }
 0x135   :  { %866 = vmatpush3.bf16.msra.mxu1 %v957_v31 }
 0x136   :  { %867 = vmatprep.subr.bf16.mxu1 %v1071_v0 }
 0x139   :  { %868 = vmatpush3.bf16.msra.mxu1 %v958_v32 }
 0x13a   :  { %869 = vmatprep.subr.bf16.mxu1 %v1071_v0 }
 0x13d   :  { %870 = vmatpush3.bf16.msra.mxu1 %v959_v33 }
 0x13e   :  { %871 = vmatprep.subr.bf16.mxu1 %v1071_v0 }
 0x141   :  { %872 = vmatpush3.bf16.msra.mxu1 %v960_v34 }
 0x142   :  { %873 = vmatprep.subr.bf16.mxu1 %v1071_v0 }
 0x145   :  { %874 = vmatpush3.bf16.msra.mxu1 %v961_v35 }
 0x146   :  { %875 = vmatprep.subr.bf16.mxu1 %v1071_v0 }
 0x149   :  { %876 = vmatpush3.bf16.msra.mxu1 %v962_v52 }
 0x14a   :  { %901 = vmatprep.subr.bf16.mxu1 %v1071_v0 }
 0x1ff   :  { %v257_v37 = vpop.f32.mrb[0].mxu1 }
 0x200   :  { %v258_v38 = vadd.f32 %v720_v36, %v257_v37  ;;  %v839_v39 = vpop.f32.mrb[1].mxu1 }
 0x201   :  { %v260_v40 = vpop.f32.mrb[2].mxu1 }
 0x202   :  { %v263_v41 = vmax.f32 %v258_v38, 0.0  ;;  %v840_v42 = vpop.f32.mrb[3].mxu1 }
 0x204   :  { %v264_v44 = vpack.c.bf16 %v263_v41, %v263_v41 }
 0x206   :  { %858 = vmatmul.mubr.bf16.vlgmr.msra.gmra.mrb[4].mxu0 %v264_v44 }
 0x207   :  { %882 = vmatpush3.bf16.msra.mxu0 %v947_v43  ;;  %897 = vmatprep.mubr.msk.bf16.mxu0 %vm1072_vm0, %v1071_v0 }
 0x208   :  { %883 = vmatprep.subr.bf16.mxu0 %v1071_v0 }
 0x20b   :  { %884 = vmatpush3.bf16.msra.mxu0 %v948_v45 }
 0x20c   :  { %885 = vmatprep.subr.bf16.mxu0 %v1071_v0 }
 0x20f   :  { %886 = vmatpush3.bf16.msra.mxu0 %v949_v46 }
 0x210   :  { %887 = vmatprep.subr.bf16.mxu0 %v1071_v0 }
 0x213   :  { %888 = vmatpush3.bf16.msra.mxu0 %v950_v47 }
 0x214   :  { %889 = vmatprep.subr.bf16.mxu0 %v1071_v0 }
 0x217   :  { %890 = vmatpush3.bf16.msra.mxu0 %v951_v48 }
 0x218   :  { %891 = vmatprep.subr.bf16.mxu0 %v1071_v0 }
 0x21b   :  { %892 = vmatpush3.bf16.msra.mxu0 %v952_v49 }
 0x21c   :  { %893 = vmatprep.subr.bf16.mxu0 %v1071_v0 }
 0x21f   :  { %894 = vmatpush3.bf16.msra.mxu0 %v953_v50 }
 0x220   :  { %895 = vmatprep.subr.bf16.mxu0 %v1071_v0 }
 0x223   :  { %896 = vmatpush3.bf16.msra.mxu0 %v954_v51 }
 0x226   :  { %898 = vmatmul.mubr.bf16.vlgmr.msra.gmra.mrb[8].mxu0 %v264_v44 }
 0x2d9   :  { %v368_v54 = vpop.f32.mrb[4].mxu0 }
 0x2da   :  { %v369_v55 = vadd.f32 %v729_v53, %v368_v54  ;;  %v859_v56 = vpop.f32.mrb[5].mxu0 }
 0x2db   :  { %v371_v57 = vpop.f32.mrb[6].mxu0 }
 0x2dc   :  { %v374_v58 = vmax.f32 %v369_v55, 0.0  ;;  %v860_v59 = vpop.f32.mrb[7].mxu0 }
 0x2de   :  { %v375_v61 = vpack.c.bf16 %v374_v58, %v374_v58 }
 0x2e0   :  { %878 = vmatmul.mubr.bf16.vlgmr.msra.gmra.mrb[4].mxu1 %v375_v61 }
 0x2e1   :  { %902 = vmatpush3.bf16.msra.mxu1 %v963_v60  ;;  %917 = vmatprep.mubr.msk.bf16.mxu1 %vm1072_vm0, %v1071_v0 }
 0x2e2   :  { %903 = vmatprep.subr.bf16.mxu1 %v1071_v0 }
 0x2e5   :  { %904 = vmatpush3.bf16.msra.mxu1 %v964_v62 }
 0x2e6   :  { %905 = vmatprep.subr.bf16.mxu1 %v1071_v0 }
 0x2e9   :  { %906 = vmatpush3.bf16.msra.mxu1 %v965_v63 }
 0x2ea   :  { %907 = vmatprep.subr.bf16.mxu1 %v1071_v0 }
 0x2ed   :  { %908 = vmatpush3.bf16.msra.mxu1 %v966_v1 }
 0x2ee   :  { %909 = vmatprep.subr.bf16.mxu1 %v1071_v0 }
 0x2f1   :  { %910 = vmatpush3.bf16.msra.mxu1 %v967_v2 }
 0x2f2   :  { %911 = vmatprep.subr.bf16.mxu1 %v1071_v0 }
 0x2f5   :  { %912 = vmatpush3.bf16.msra.mxu1 %v968_v3 }
 0x2f6   :  { %913 = vmatprep.subr.bf16.mxu1 %v1071_v0 }
 0x2f9   :  { %v589_v6 = vpop.f32.mrb[8].mxu0  ;;  %914 = vmatpush3.bf16.msra.mxu1 %v969_v4 }
 0x2fa   :  { %v590_v8 = vadd.f32 %v747_v5, %v589_v6  ;;  %v899_v9 = vpop.f32.mrb[9].mxu0  ;;  %915 = vmatprep.subr.bf16.mxu1 %v1071_v0  ;;  %v756_v0 = vld [vmem:[%s1304_s1 + $0x5] ss:$0 sm:$0xff] }
 0x2fb   :  { %v592_v10 = vpop.f32.mrb[10].mxu0 }
 0x2fc   :  { %v595_v11 = vmax.f32 %v590_v8, 0.0  ;;  %v900_v12 = vpop.f32.mrb[11].mxu0 }
 0x2fd   :  { %916 = vmatpush3.bf16.msra.mxu1 %v970_v7 }
 0x2fe   :  { %v596_v13 = vpack.c.bf16 %v595_v11, %v595_v11 }
 0x300   :  { %918 = vmatmul.mubr.bf16.vlgmr.msra.gmra.mrb[8].mxu1 %v596_v13 }
 0x3b3   :  { %v479_v15 = vpop.f32.mrb[4].mxu1 }
 0x3b4   :  { %v480_v16 = vadd.f32 %v738_v14, %v479_v15  ;;  %v879_v17 = vpop.f32.mrb[5].mxu1 }
 0x3b5   :  { %v482_v18 = vpop.f32.mrb[6].mxu1 }
 0x3b6   :  { %v485_v19 = vmax.f32 %v480_v16, 0.0  ;;  %v880_v20 = vpop.f32.mrb[7].mxu1 }
 0x3b8   :  { %707 = vst [vmem:[%s1311_s8] sm:$0xff] %v485_v19 }
 0x3d3   :  { %v700_v21 = vpop.f32.mrb[8].mxu1 }
 0x3d4   :  { %v701_v22 = vadd.f32 %v756_v0, %v700_v21  ;;  %v919_v23 = vpop.f32.mrb[9].mxu1 }
 0x3d5   :  { %v703_v24 = vpop.f32.mrb[10].mxu1 }
 0x3d6   :  { %v706_v25 = vmax.f32 %v701_v22, 0.0  ;;  %v920_v26 = vpop.f32.mrb[11].mxu1 }
 0x3d8   :  { %708 = vst [vmem:[%s1311_s8 + $0x8] sm:$0xff] %v706_v25 }
 0x3d9   :  { %713 = vsyncpa [#allocation3], 1 }
 0x3da   :  { %714 = vsyncpa [#allocation5], 1 }
 0x3db   :  { %715 = vsyncpa [#allocation8], 1 }

</bundles_post_ra>
